<compile_context>
chip_gen: v7x
topology: tpu7x:2x2x1
jax: 0.10.0
libtpu: 0.0.40
codegen_flags: <defaults>
</compile_context>

<pallas_src>
import functools

import jax
import jax.numpy as jnp
from jax.experimental import pallas as pl
from jax.experimental.pallas import tpu as pltpu

CTX_DIM = 300  # hard-coded by the PyTorch module


def _round_up(x, m):
    return (x + m - 1) // m * m


def question_attention_kernel(act_ref, q_ref, w_ref, wa_ref, out_ref, *, bb, S, dim, gp):
    # One fused MXU matmul: [ctx | q | 1] @ [[Wt_c|Ws_c], [Wt_q|Ws_q], [bt|bs]] -> (bb*S, 2*gp)
    pre = jnp.dot(act_ref[...], w_ref[...], preferred_element_type=jnp.float32)

    # gp is a multiple of 128, so both halves are vreg-aligned slices (no lane shift).
    # Pad lanes carry zero weight + zero bias -> pre == 0 -> tanh(0) * sigmoid(0) == 0 there.
    gated = jnp.tanh(pre[:, :gp]) * jax.nn.sigmoid(pre[:, gp:])          # (bb*S, gp)

    # attn Linear(dim, 1) as VPU multiply + lane (XLU) reduce; wa is zero-padded to gp lanes
    # and the attn bias is dropped (it cancels in softmax).
    att = jnp.sum(gated * wa_ref[...], axis=-1, keepdims=True)           # (bb*S, 1)

    # Per-batch softmax over the sequence axis.  (bb*S, .) -> (bb, S, .) views split the
    # sublane axis on an 8-row boundary (S == 8, f32), so no relayout copies materialize.
    logits = att.reshape(bb, S, 1)
    m = jnp.max(logits, axis=1, keepdims=True)                           # (bb, 1, 1)
    e = jnp.exp(logits - m)                                              # (bb, S, 1)
    denom = jnp.sum(e, axis=1)                                           # (bb, 1)

    # Un-normalized weighted sum over the sequence, then ONE reciprocal per output row
    # (normalizing after the reduce saves bb*S*dim multiplies vs normalizing the weights).
    q3 = q_ref[...].reshape(bb, S, dim)                                  # stays f32
    num = jnp.sum(e * q3, axis=1)                                        # (bb, dim)
    out_ref[...] = num * pl.reciprocal(denom, approx=True)               # (bb, dim) lane-dense store


def prepare_params(params, dim, ctx_dim=CTX_DIM):
    """ONE-TIME weight fusion (hoisted out of the per-call path).

    Returns:
      w_fused: (ctx_dim + dim + 1, 2*gp) bf16 -- [tanh | sigmoid] gate weights stacked over
               [ctx rows | question rows | bias row], each gate zero-padded to gp output lanes.
      wa_row:  (1, gp) f32 -- attn weight row, zero-padded (attn bias dropped: cancels in softmax).
    """
    wtc, wtq, bt, wsc, wsq, bs, wa, ba = params
    del ba  # uniform additive logit bias cancels under softmax shift invariance
    gp = _round_up(dim, 128)
    ktot = ctx_dim + dim + 1

    w = jnp.zeros((ktot, 2 * gp), jnp.float32)
    w = w.at[:ctx_dim, :dim].set(wtc)
    w = w.at[ctx_dim:ctx_dim + dim, :dim].set(wtq)
    w = w.at[ctx_dim + dim, :dim].set(bt[0])
    w = w.at[:ctx_dim, gp:gp + dim].set(wsc)
    w = w.at[ctx_dim:ctx_dim + dim, gp:gp + dim].set(wsq)
    w = w.at[ctx_dim + dim, gp:gp + dim].set(bs[0])

    wa_row = jnp.zeros((1, gp), jnp.float32).at[0, :dim].set(wa[:, 0])
    return w.astype(jnp.bfloat16), wa_row


def question_attention(context, question, prepared, *, batch_block=None):
    """context: (B, S, 300) f32, question: (B, S, dim) f32 -> (B, dim) f32."""
    w_fused, wa_row = prepared
    B, S, cc = context.shape
    dim = question.shape[-1]
    ktot, two_gp = w_fused.shape
    gp = two_gp // 2
    assert ktot == cc + dim + 1

    # Batch tiling: grid over batch chunks (parallel) so v7x's two TensorCores can split large
    # batches and VMEM stays bounded (v7x has only 64 MiB physical / 32 MiB default scoped).
    # At the tiny test shape batch_block == B -> single grid step, no per-step overhead.
    bb = B if batch_block is None else batch_block
    assert B % bb == 0 and (bb == B or bb % 8 == 0)

    q_flat = question.reshape(B * S, dim)                 # stays f32 (used in the weighted sum)
    ones = jnp.ones((B * S, 1), jnp.float32)              # consumes the folded gate-bias row
    act = jnp.concatenate([context.reshape(B * S, cc), q_flat, ones], axis=-1)
    act = act.astype(jnp.bfloat16)                        # bf16 MXU operands, f32 accumulation

    kernel = functools.partial(question_attention_kernel, bb=bb, S=S, dim=dim, gp=gp)

    cost = pl.CostEstimate(
        flops=2 * B * S * ktot * two_gp + 8 * B * S * gp + 4 * B * S * dim,
        transcendentals=B * S * (two_gp + 1),
        bytes_accessed=(act.size * 2 + q_flat.size * 4 + w_fused.size * 2
                        + wa_row.size * 4 + B * dim * 4),
    )

    return pl.pallas_call(
        kernel,
        out_shape=jax.ShapeDtypeStruct((B, dim), jnp.float32),
        grid_spec=pltpu.PrefetchScalarGridSpec(
            num_scalar_prefetch=0,
            grid=(B // bb,),
            in_specs=[
                pl.BlockSpec((bb * S, ktot), lambda i: (i, 0)),   # activations: tiled over batch
                pl.BlockSpec((bb * S, dim), lambda i: (i, 0)),    # question (f32) for the reduce
                pl.BlockSpec((ktot, two_gp), lambda i: (0, 0)),   # fused weight: resident
                pl.BlockSpec((1, gp), lambda i: (0, 0)),          # attn row: resident
            ],
            out_specs=pl.BlockSpec((bb, dim), lambda i: (i, 0)),
        ),
        compiler_params=pltpu.CompilerParams(dimension_semantics=("parallel",)),
        cost_estimate=cost,
    )(act, q_flat, w_fused, wa_row)


def init_params(key, dim, ctx_dim=CTX_DIM):
    """Deterministic xavier_uniform weights / zero biases, matching the module's __init__."""
    k1, k2, k3 = jax.random.split(key, 3)

    def xavier(k, out_d, in_d):
        bound = (6.0 / (in_d + out_d)) ** 0.5
        return jax.random.uniform(k, (out_d, in_d), jnp.float32, -bound, bound)

    w_tanh = xavier(k1, dim, ctx_dim + dim)       # PyTorch layout (out, in)
    w_sig = xavier(k2, dim, ctx_dim + dim)
    w_attn = xavier(k3, 1, dim)

    wtc = w_tanh[:, :ctx_dim].T                   # (300, dim)
    wtq = w_tanh[:, ctx_dim:].T                   # (dim, dim)
    wsc = w_sig[:, :ctx_dim].T
    wsq = w_sig[:, ctx_dim:].T
    wa = w_attn.T                                 # (dim, 1)

    bt = jnp.zeros((1, dim), jnp.float32)
    bs = jnp.zeros((1, dim), jnp.float32)
    ba = jnp.zeros((1, 1), jnp.float32)
    return (wtc, wtq, bt, wsc, wsq, bs, wa, ba)


def reference(context, question, params):
    """Pure-JAX f32 reference mirroring the PyTorch forward exactly (including attn bias)."""
    wtc, wtq, bt, wsc, wsq, bs, wa, ba = params
    h = jnp.tanh(context @ wtc + question @ wtq + bt)
    g = jax.nn.sigmoid(context @ wsc + question @ wsq + bs)
    gated = h * g
    a = gated @ wa + ba                           # (B, S, 1)
    attn = jax.nn.softmax(a[..., 0], axis=1)      # (B, S)
    return jnp.einsum("bs,bsd->bd", attn, question)


if __name__ == "__main__":
    B, S, DIM = 2, 8, 32                          # ctx feature dim 300 is fixed by the module

    key = jax.random.PRNGKey(0)
    k_ctx, k_q, k_p = jax.random.split(key, 3)
    context = jax.random.normal(k_ctx, (B, S, CTX_DIM), jnp.float32)
    question = jax.random.normal(k_q, (B, S, DIM), jnp.float32)

    params = init_params(k_p, DIM, CTX_DIM)
    prepared = prepare_params(params, DIM, CTX_DIM)   # one-time fusion, NOT per forward

    out = jax.block_until_ready(question_attention(context, question, prepared))
    ref = jax.block_until_ready(reference(context, question, params))

    assert out.shape == (B, DIM)
    # bf16 MXU operands + approx softmax reciprocal -> slightly looser tolerance than pure f32.
    assert jnp.allclose(out, ref, rtol=2e-2, atol=2e-2), "mismatch vs reference"

    # TODO(synk): the PyTorch module's trailing .squeeze() misbehaves for B == 1; this kernel
    # assumes B > 1 like the module's intended use.
    print("KERNEL_OK")
</pallas_src>

<mosaic_0001>
module attributes {stable_mosaic.version = 11 : i64} {
  func.func @question_attention_kernel(%arg0: i32, %arg1: memref<16x333xbf16, #tpu.memory_space<vmem>>, %arg2: memref<16x32xf32, #tpu.memory_space<vmem>>, %arg3: memref<333x256xbf16, #tpu.memory_space<vmem>>, %arg4: memref<1x128xf32, #tpu.memory_space<vmem>>, %arg5: memref<2x32xf32, #tpu.memory_space<vmem>>) attributes {dimension_semantics = [#tpu.dimension_semantics<parallel>], iteration_bounds = array<i64: 1>, scalar_prefetch = 0 : i64, scratch_operands = 0 : i64, tpu.core_type = #tpu.core_type<tc>, window_params = [{transform_indices = @transform_0, window_bounds = array<i64: 16, 333>}, {transform_indices = @transform_1, window_bounds = array<i64: 16, 32>}, {pipeline_mode = #tpu.pipeline_mode<synchronous>, transform_indices = @transform_2, window_bounds = array<i64: 333, 256>}, {pipeline_mode = #tpu.pipeline_mode<synchronous>, transform_indices = @transform_3, window_bounds = array<i64: 1, 128>}, {transform_indices = @transform_4, window_bounds = array<i64: 2, 32>}]} {
    %c0 = arith.constant 0 : index
    %c0_0 = arith.constant 0 : index
    %0 = vector.load %arg1[%c0, %c0_0] : memref<16x333xbf16, #tpu.memory_space<vmem>>, vector<16x333xbf16>
    %c0_1 = arith.constant 0 : index
    %c0_2 = arith.constant 0 : index
    %1 = vector.load %arg3[%c0_1, %c0_2] : memref<333x256xbf16, #tpu.memory_space<vmem>>, vector<333x256xbf16>
    %cst = arith.constant dense<0.000000e+00> : vector<16x256xf32>
    %2 = tpu.matmul %0, %1, %cst {dimension_numbers = #tpu.dot_dimension_numbers<[1], [0], [0], [1], [0, 0, 1, 1], [], []>} : vector<16x333xbf16>, vector<333x256xbf16>, vector<16x256xf32> -> vector<16x256xf32>
    %3 = vector.extract_strided_slice %2 {offsets = [0, 0], sizes = [16, 128], strides = [1, 1]} : vector<16x256xf32> to vector<16x128xf32>
    %4 = math.tanh %3 : vector<16x128xf32>
    %5 = vector.extract_strided_slice %2 {offsets = [0, 128], sizes = [16, 128], strides = [1, 1]} : vector<16x256xf32> to vector<16x128xf32>
    %6 = arith.negf %5 : vector<16x128xf32>
    %7 = math.exp %6 : vector<16x128xf32>
    %cst_3 = arith.constant 1.000000e+00 : f32
    %8 = vector.broadcast %cst_3 : f32 to vector<16x128xf32>
    %9 = arith.addf %8, %7 : vector<16x128xf32>
    %10 = arith.divf %8, %9 : vector<16x128xf32>
    %11 = arith.mulf %4, %10 : vector<16x128xf32>
    %c0_4 = arith.constant 0 : index
    %c0_5 = arith.constant 0 : index
    %12 = vector.load %arg4[%c0_4, %c0_5] : memref<1x128xf32, #tpu.memory_space<vmem>>, vector<1x128xf32>
    %13 = vector.broadcast %12 : vector<1x128xf32> to vector<16x128xf32>
    %14 = arith.mulf %11, %13 : vector<16x128xf32>
    %cst_6 = arith.constant dense<0.000000e+00> : vector<16xf32>
    %15 = vector.multi_reduction <add>, %14, %cst_6 [1] : vector<16x128xf32> to vector<16xf32>
    %16 = vector.shape_cast %15 : vector<16xf32> to vector<16x1xf32>
    %17 = vector.shape_cast %16 : vector<16x1xf32> to vector<2x8x1xf32>
    %cst_7 = arith.constant dense<0xFF800000> : vector<2x1xf32>
    %18 = vector.multi_reduction <maximumf>, %17, %cst_7 [1] : vector<2x8x1xf32> to vector<2x1xf32>
    %19 = vector.shape_cast %18 : vector<2x1xf32> to vector<2x1x1xf32>
    %20 = vector.broadcast %19 : vector<2x1x1xf32> to vector<2x8x1xf32>
    %21 = arith.subf %17, %20 : vector<2x8x1xf32>
    %22 = math.exp %21 : vector<2x8x1xf32>
    %cst_8 = arith.constant dense<0.000000e+00> : vector<2x1xf32>
    %23 = vector.multi_reduction <add>, %22, %cst_8 [1] : vector<2x8x1xf32> to vector<2x1xf32>
    %c0_9 = arith.constant 0 : index
    %c0_10 = arith.constant 0 : index
    %24 = vector.load %arg2[%c0_9, %c0_10] : memref<16x32xf32, #tpu.memory_space<vmem>>, vector<16x32xf32>
    %25 = vector.shape_cast %24 : vector<16x32xf32> to vector<2x8x32xf32>
    %26 = vector.broadcast %22 : vector<2x8x1xf32> to vector<2x8x32xf32>
    %27 = arith.mulf %26, %25 : vector<2x8x32xf32>
    %cst_11 = arith.constant dense<0.000000e+00> : vector<2x32xf32>
    %28 = vector.multi_reduction <add>, %27, %cst_11 [1] : vector<2x8x32xf32> to vector<2x32xf32>
    %29 = tpu.reciprocal %23 {approx = true} : vector<2x1xf32> -> vector<2x1xf32>
    %30 = vector.broadcast %29 : vector<2x1xf32> to vector<2x32xf32>
    %31 = arith.mulf %28, %30 : vector<2x32xf32>
    %c0_12 = arith.constant 0 : index
    %c0_13 = arith.constant 0 : index
    %32 = vector.load %arg5[%c0_12, %c0_13] : memref<2x32xf32, #tpu.memory_space<vmem>>, vector<2x32xf32>
    tpu.vector_store %arg5[%c0_12, %c0_13], %31 {strides = array<i32>} : memref<2x32xf32, #tpu.memory_space<vmem>>, vector<2x32xf32>,
    return
  }
  func.func @transform_0(%arg0: i32) -> (i32, i32) {
    %c0_i32 = arith.constant 0 : i32
    %c0_i32_0 = arith.constant 0 : i32
    return %arg0, %c0_i32 : i32, i32
  }
  func.func @transform_1(%arg0: i32) -> (i32, i32) {
    %c0_i32 = arith.constant 0 : i32
    %c0_i32_0 = arith.constant 0 : i32
    return %arg0, %c0_i32 : i32, i32
  }
  func.func @transform_2(%arg0: i32) -> (i32, i32) {
    %c0_i32 = arith.constant 0 : i32
    %c0_i32_0 = arith.constant 0 : i32
    %c0_i32_1 = arith.constant 0 : i32
    return %c0_i32, %c0_i32_0 : i32, i32
  }
  func.func @transform_3(%arg0: i32) -> (i32, i32) {
    %c0_i32 = arith.constant 0 : i32
    %c0_i32_0 = arith.constant 0 : i32
    %c0_i32_1 = arith.constant 0 : i32
    return %c0_i32, %c0_i32_0 : i32, i32
  }
  func.func @transform_4(%arg0: i32) -> (i32, i32) {
    %c0_i32 = arith.constant 0 : i32
    %c0_i32_0 = arith.constant 0 : i32
    return %arg0, %c0_i32 : i32, i32
  }
}

</mosaic_0001>

<bundles_post_ra>
// kernel: tpu_custom_call.1
= control target key start
LH: loop header
LB: loop body
LE: loop exit
PB: predicated region body
PF: predicated region fallthrough
CT: control target
= control target key end

     0   :  { %9 = vsyncpa [#allocation3], 0  ;;  %s870_s0 = inlined_call_operand.hbm [shape: bf16[16,333], index: 0, kind: input, shape index: {}]   ;;  %s871_s1 = inlined_call_operand.hbm [shape: f32[16,32], index: 1, kind: input, shape index: {}]   ;;  %s872_s2 = inlined_call_operand.hbm [shape: bf16[333,256], index: 2, kind: input, shape index: {}]   ;;  %s873_s3 = inlined_call_operand.vmem [shape: f32[1,128], index: 3, kind: input, shape index: {}]   ;;  %s874_s4 = inlined_call_operand.hbm [shape: f32[2,32], index: 4, kind: output, shape index: {}]  }
   0x1   :  { %10 = vsyncpa [#allocation6], 0 }
   0x2   :  { %11 = vsyncpa [#allocation4], 0  ;;  %s778_s15 = smov [#allocation5]   ;;  %s684_s19 = scalar_lea.hbm %s871_s1, 256 }
   0x3   :  { %s29_s16 = sshll.u32 %s778_s15, 4  ;;  %p685_p0 = scmp.ne.s32.totalorder %s871_s1, %s684_s19  ;;  %s30_s16 = int_to_ptr.vmem [resolvable:$true] %s29_s16 }
   0x4   :  { %p688_p1 = scmp.lt.u32.totalorder %s684_s19, %s871_s1 }
   0x6   :  { %p690_p2 = pnand %p688_p1, %p685_p0 }
   0x8   :  { %693 = shalt.err (!%p690_p2)
}
   0x9   :  { %s694_s24 = scalar_lea.vmem %s30_s16, 256  ;;  %p699_p4 = scmp.lt.s32.totalorder %s30_s16, %s30_s16 }
   0xa   :  { %p695_p3 = scmp.ne.s32.totalorder %s30_s16, %s694_s24  ;;  %p700_p5 = scmp.lt.s32.totalorder %s694_s24, %s694_s24 }
   0xc   :  { %p701_p6 = por %p700_p5, %p699_p4 }
   0xe   :  { %p702_p7 = pnand %p701_p6, %p695_p3 }
  0x10   :  { %705 = shalt.err (!%p702_p7)
}
  0x11   :  { %s779_s25 = smov 128   ;;  %s780_s26 = smov 8  }
  0x12   :  { %35 = dma.hbm_to_vmem [thread:$0]  %s871_s1, 256, %s30_s16, [#allocation6], %s779_s25, %s779_s25, %s780_s26  }
  0x13   :  { %s781_s29 = smov [#allocation2]   ;;  %s706_s7 = scalar_lea.hbm %s870_s0, 384 }
  0x14   :  { %s17_s30 = sshll.u32 %s781_s29, 4  ;;  %p707_p8 = scmp.ne.s32.totalorder %s870_s0, %s706_s7  ;;  %s18_s30 = int_to_ptr.vmem [resolvable:$true] %s17_s30 }
  0x15   :  { %p710_p9 = scmp.lt.u32.totalorder %s706_s7, %s870_s0 }
  0x17   :  { %p712_p10 = pnand %p710_p9, %p707_p8 }
  0x19   :  { %715 = shalt.err (!%p712_p10)
}
  0x1a   :  { %s716_s12 = scalar_lea.vmem %s18_s30, 384  ;;  %p721_p12 = scmp.lt.s32.totalorder %s18_s30, %s18_s30 }
  0x1b   :  { %p717_p11 = scmp.ne.s32.totalorder %s18_s30, %s716_s12  ;;  %p722_p13 = scmp.lt.s32.totalorder %s716_s12, %s716_s12 }
  0x1d   :  { %p723_p0 = por %p722_p13, %p721_p12 }
  0x1f   :  { %p724_p1 = pnand %p723_p0, %p717_p11 }
  0x21   :  { %727 = shalt.err (!%p724_p1)
}
  0x22   :  { %s782_s1 = smov 192   ;;  %s783_s13 = smov 12  }
  0x23   :  { %23 = dma.hbm_to_vmem [thread:$0]  %s870_s0, 384, %s18_s30, [#allocation3], %s782_s1, %s782_s1, %s783_s13  }
  0x24   :  { %s784_s16 = smov [#allocation7]   ;;  %s728_s20 = scalar_lea.hbm %s872_s2, 5376 }
  0x25   :  { %s41_s17 = sshll.u32 %s784_s16, 4  ;;  %p729_p2 = scmp.ne.s32.totalorder %s872_s2, %s728_s20  ;;  %s42_s17 = int_to_ptr.vmem [resolvable:$true] %s41_s17 }
  0x26   :  { %p732_p3 = scmp.lt.u32.totalorder %s728_s20, %s872_s2 }
  0x28   :  { %p734_p4 = pnand %p732_p3, %p729_p2 }
  0x2a   :  { %737 = shalt.err (!%p734_p4)
}
  0x2b   :  { %s738_s27 = scalar_lea.vmem %s42_s17, 5376  ;;  %p743_p6 = scmp.lt.s32.totalorder %s42_s17, %s42_s17 }
  0x2c   :  { %p739_p5 = scmp.ne.s32.totalorder %s42_s17, %s738_s27  ;;  %p744_p7 = scmp.lt.s32.totalorder %s738_s27, %s738_s27 }
  0x2e   :  { %p745_p8 = por %p744_p7, %p743_p6 }
  0x30   :  { %p746_p9 = pnand %p745_p8, %p739_p5 }
  0x32   :  { %749 = shalt.err (!%p746_p9)
}
  0x33   :  { %47 = dma.hbm_to_vmem [thread:$0]  %s872_s2, 5376, %s42_s17, [#allocation6], %s779_s25, %s779_s25, %s780_s26  }
  0x34   :  { %772 = dma.done.wait [#allocation3], 384  }
  0x35   :  { %773 = vsyncadd [#allocation3], 4294966912 }
  0x36   :  { %774 = dma.done.wait [#allocation6], 5632  }
  0x37   :  { %775 = vsyncadd [#allocation6], 4294961664  ;;  %v785_v0 = vmov 0   ;;  %v597_v1 = vld [vmem:[#allocation7 + $0x4] ss:$8 sps:$4 sm:$0xff]   ;;  %vm333_vm0 = vcmask 1045504  }
  0x38   :  { %418 = vmatprep.mubr.bf16.mxu0 %v785_v0  ;;  %v599_v2 = vld [vmem:[#allocation7] ss:$8 sps:$4 sm:$0xff]   ;;  %343 = vmatprep.subr.bf16.mxu1 %v597_v1  ;;  %v600_v3 = vld [vmem:[#allocation7 + $0x14] ss:$8 sps:$4 sm:$0xff]   ;;  %v602_v4 = vld [vmem:[#allocation7 + $0x10] ss:$8 sps:$4 sm:$0xff]  }
  0x39   :  { %344 = vmatpush1.bf16.msra.mxu1 %v599_v2  ;;  %v603_v5 = vld [vmem:[#allocation7 + $0x24] ss:$8 sps:$4 sm:$0xff]   ;;  %v605_v6 = vld [vmem:[#allocation7 + $0x20] ss:$8 sps:$4 sm:$0xff]   ;;  %v606_v7 = vld [vmem:[#allocation7 + $0x34] ss:$8 sps:$4 sm:$0xff]  }
  0x3a   :  { %345 = vmatprep.subr.bf16.mxu1 %v600_v3  ;;  %v608_v8 = vld [vmem:[#allocation7 + $0x30] ss:$8 sps:$4 sm:$0xff]   ;;  %v609_v9 = vld [vmem:[#allocation7 + $0x44] ss:$8 sps:$4 sm:$0xff]   ;;  %v611_v10 = vld [vmem:[#allocation7 + $0x40] ss:$8 sps:$4 sm:$0xff]  }
  0x3b   :  { %v630_v11 = vld [vmem:[#allocation7 + $0x104] ss:$8 sps:$4 sm:$0xff]   ;;  %v632_v12 = vld [vmem:[#allocation7 + $0x100] ss:$8 sps:$4 sm:$0xff]   ;;  %v612_v13 = vld [vmem:[#allocation7 + $0x54] ss:$8 sps:$4 sm:$0xff]  }
  0x3c   :  { %386 = vmatprep.subr.bf16.mxu0 %v630_v11  ;;  %v636_v14 = vld [vmem:[#allocation7 + $0x114] ss:$8 sps:$4 sm:$0xff]   ;;  %v638_v15 = vld [vmem:[#allocation7 + $0x110] ss:$8 sps:$4 sm:$0xff]   ;;  %v615_v17 = vld [vmem:[#allocation7 + $0x64] ss:$8 sps:$4 sm:$0xff]  }
  0x3d   :  { %346 = vmatpush1.bf16.msra.mxu1 %v602_v4  ;;  %387 = vmatpush1.bf16.msra.mxu0 %v632_v12  ;;  %v614_v16 = vld [vmem:[#allocation7 + $0x50] ss:$8 sps:$4 sm:$0xff]   ;;  %v642_v18 = vld [vmem:[#allocation7 + $0x124] ss:$8 sps:$4 sm:$0xff]   ;;  %v644_v19 = vld [vmem:[#allocation7 + $0x120] ss:$8 sps:$4 sm:$0xff]  }
  0x3e   :  { %347 = vmatprep.subr.bf16.mxu1 %v603_v5  ;;  %388 = vmatprep.subr.bf16.mxu0 %v636_v14  ;;  %vm334_vm1 = vcmask 1046528   ;;  %v786_v20 = vmov 65535   ;;  %v617_v22 = vld [vmem:[#allocation7 + $0x60] ss:$8 sps:$4 sm:$0xff]   ;;  %v648_v23 = vld [vmem:[#allocation7 + $0x134] ss:$8 sps:$4 sm:$0xff]  }
  0x3f   :  { %v335_v21 = vsel %vm333_vm0, 4294967295, %v786_v20  ;;  %v618_v24 = vld [vmem:[#allocation7 + $0x74] ss:$8 sps:$4 sm:$0xff]   ;;  %v650_v25 = vld [vmem:[#allocation7 + $0x130] ss:$8 sps:$4 sm:$0xff]   ;;  %vm329_vm2 = vcmask 629760  }
  0x40   :  { %v336_v26 = vsel %vm334_vm1, %v335_v21, 0  ;;  %v654_v27 = vld [vmem:[#allocation7 + $0x144] ss:$8 sps:$4 sm:$0x7f]   ;;  %v620_v29 = vld [vmem:[#allocation7 + $0x70] ss:$8 sps:$4 sm:$0xff]  }
  0x41   :  { %348 = vmatpush1.bf16.msra.mxu1 %v605_v6  ;;  %389 = vmatpush1.bf16.msra.mxu0 %v638_v15  ;;  %v656_v28 = vld [vmem:[#allocation7 + $0x140] ss:$8 sps:$4 sm:$0x7f]   ;;  %v621_v30 = vld [vmem:[#allocation7 + $0x84] ss:$8 sps:$4 sm:$0xff]   ;;  %v341_v31 = vand.u32 %v654_v27, %v336_v26  ;;  %vm492_vm3 = vcmask 261120  }
  0x42   :  { %349 = vmatprep.subr.bf16.mxu1 %v606_v7  ;;  %390 = vmatprep.subr.bf16.mxu0 %v642_v18  ;;  %v338_v32 = vand.u32 %v656_v28, %v336_v26  ;;  %v663_v33 = vld [vmem:[#allocation2 + $0x4] ss:$12 sps:$4 sm:$0xff]   ;;  %v660_v36 = vld [vmem:[#allocation2 + $0x8] ss:$12 sps:$4 sm:$0xff]   ;;  %v626_v37 = vld [vmem:[#allocation7 + $0x90] ss:$8 sps:$4 sm:$0xff]  }
  0x43   :  { %v623_v34 = vld [vmem:[#allocation7 + $0x80] ss:$8 sps:$4 sm:$0xff]   ;;  %v624_v35 = vld [vmem:[#allocation7 + $0x94] ss:$8 sps:$4 sm:$0xff]   ;;  %375 = vmatprep.mubr.bf16.mxu1 %v663_v33  ;;  %v627_v38 = vld [vmem:[#allocation7 + $0xa4] ss:$8 sps:$4 sm:$0xff]  }
  0x44   :  { %v629_v39 = vld [vmem:[#allocation7 + $0xa0] ss:$8 sps:$4 sm:$0xff]   ;;  %v633_v40 = vld [vmem:[#allocation7 + $0xb4] ss:$8 sps:$4 sm:$0xff]   ;;  %v635_v41 = vld [vmem:[#allocation7 + $0xb0] ss:$8 sps:$4 sm:$0xff]  }
  0x45   :  { %350 = vmatpush1.bf16.msra.mxu1 %v608_v8  ;;  %391 = vmatpush1.bf16.msra.mxu0 %v644_v19  ;;  %v639_v42 = vld [vmem:[#allocation7 + $0xc4] ss:$8 sps:$4 sm:$0xff]   ;;  %v641_v43 = vld [vmem:[#allocation7 + $0xc0] ss:$8 sps:$4 sm:$0xff]   ;;  %v645_v44 = vld [vmem:[#allocation7 + $0xd4] ss:$8 sps:$4 sm:$0xff]  }
  0x46   :  { %351 = vmatprep.subr.bf16.mxu1 %v609_v9  ;;  %392 = vmatprep.subr.bf16.mxu0 %v648_v23  ;;  %v647_v45 = vld [vmem:[#allocation7 + $0xd0] ss:$8 sps:$4 sm:$0xff]   ;;  %v651_v46 = vld [vmem:[#allocation7 + $0xe4] ss:$8 sps:$4 sm:$0xff]   ;;  %v653_v47 = vld [vmem:[#allocation7 + $0xe0] ss:$8 sps:$4 sm:$0xff]  }
  0x47   :  { %v657_v48 = vld [vmem:[#allocation7 + $0xf4] ss:$8 sps:$4 sm:$0xff]   ;;  %v659_v49 = vld [vmem:[#allocation7 + $0xf0] ss:$8 sps:$4 sm:$0xff]   ;;  %vm513_vm4 = vcmask 1041409   ;;  %vm516_vm5 = vcmask 254976  }
  0x48   :  { %v661_v50 = vld [vmem:[#allocation2] ss:$12 sps:$4 sm:$0xff]  }
  0x49   :  { %352 = vmatpush1.bf16.msra.mxu1 %v611_v10  ;;  %393 = vmatpush1.bf16.msra.mxu0 %v650_v25  ;;  %v582_v7 = vld [vmem:[%s873_s3] ss:$0 sm:$0xff]  ;;  %s787_s3 = smov [#allocation8]  }
  0x4a   :  { %353 = vmatprep.subr.bf16.mxu1 %v612_v13  ;;  %394 = vmatprep.subr.bf16.mxu0 %v341_v31  ;;  %s524_s26 = sshll.u32 %s787_s3, 4  ;;  %s525_s26 = int_to_ptr.vmem [resolvable:$true] %s524_s26 }
  0x4b   :  { %s750_s29 = scalar_lea.vmem %s525_s26, 32  ;;  %p755_p11 = scmp.lt.s32.totalorder %s525_s26, %s525_s26 }
  0x4c   :  { %p751_p10 = scmp.ne.s32.totalorder %s525_s26, %s750_s29  ;;  %p756_p12 = scmp.lt.s32.totalorder %s750_s29, %s750_s29 }
  0x4d   :  { %354 = vmatpush1.bf16.msra.mxu1 %v614_v16  ;;  %395 = vmatpush1.bf16.msra.mxu0 %v338_v32  ;;  %v488_v32 = vld [vmem:[#allocation5] sm:$0xff] }
  0x4e   :  { %355 = vmatprep.subr.bf16.mxu1 %v615_v17  ;;  %p757_p13 = por %p756_p12, %p755_p11 }
  0x50   :  { %579 = vmatmul.mubr.msk.bf16.vlgmr.msra.gmra.mrb[0].mxu0 %vm329_vm2, %v660_v36  ;;  %v489_v36 = vld [vmem:[#allocation5 + $0x8] sm:$0xff]  ;;  %p758_p0 = pnand %p757_p13, %p751_p10 }
  0x51   :  { %356 = vmatpush1.bf16.msra.mxu1 %v617_v22 }
  0x52   :  { %357 = vmatprep.subr.bf16.mxu1 %v618_v24 }
  0x55   :  { %358 = vmatpush1.bf16.msra.mxu1 %v620_v29 }
  0x56   :  { %359 = vmatprep.subr.bf16.mxu1 %v621_v30 }
  0x59   :  { %360 = vmatpush1.bf16.msra.mxu1 %v623_v34 }
  0x5a   :  { %361 = vmatprep.subr.bf16.mxu1 %v624_v35 }
  0x5d   :  { %362 = vmatpush1.bf16.msra.mxu1 %v626_v37 }
  0x5e   :  { %363 = vmatprep.subr.bf16.mxu1 %v627_v38 }
  0x61   :  { %364 = vmatpush1.bf16.msra.mxu1 %v629_v39 }
  0x62   :  { %365 = vmatprep.subr.bf16.mxu1 %v633_v40 }
  0x65   :  { %366 = vmatpush1.bf16.msra.mxu1 %v635_v41 }
  0x66   :  { %367 = vmatprep.subr.bf16.mxu1 %v639_v42 }
  0x69   :  { %368 = vmatpush1.bf16.msra.mxu1 %v641_v43 }
  0x6a   :  { %369 = vmatprep.subr.bf16.mxu1 %v645_v44 }
  0x6d   :  { %370 = vmatpush1.bf16.msra.mxu1 %v647_v45 }
  0x6e   :  { %371 = vmatprep.subr.bf16.mxu1 %v651_v46 }
  0x71   :  { %372 = vmatpush1.bf16.msra.mxu1 %v653_v47 }
  0x72   :  { %373 = vmatprep.subr.bf16.mxu1 %v657_v48 }
  0x75   :  { %374 = vmatpush1.bf16.msra.mxu1 %v659_v49 }
  0x78   :  { %376 = vmatmul.mubr.bf16.vlgmr.msra.gmra.mrb[0].mxu1 %v661_v50 }
 0x123   :  { %v420_v51 = vpop.f32.mrb[0].mxu0 }
 0x124   :  { %v422_v52 = vpop.f32.mrb[1].mxu0 }
 0x125   :  { %v424_v53 = vpop.f32.mrb[2].mxu0 }
 0x126   :  { %v426_v54 = vpop.f32.mrb[3].mxu0 }
 0x14b   :  { %v377_v55 = vpop.f32.mrb[0].mxu1 }
 0x14c   :  { %v421_v56 = vadd.f32 %v420_v51, %v377_v55  ;;  %v379_v57 = vpop.f32.mrb[1].mxu1 }
 0x14d   :  { %v423_v58 = vadd.f32 %v422_v52, %v379_v57  ;;  %v381_v59 = vpop.f32.mrb[2].mxu1 }
 0x14e   :  { %v425_v60 = vadd.f32 %v424_v53, %v381_v59  ;;  %v383_v61 = vpop.f32.mrb[3].mxu1 }
 0x14f   :  { %v580_v62 = vmul.f32 -1.442695, %v423_v58  ;;  %v427_v63 = vadd.f32 %v426_v54, %v383_v61 }
 0x151   :  { %664 = vpow2.f32 %v580_v62  ;;  %v581_v0 = vmul.f32 -1.442695, %v427_v63 }
 0x153   :  { %666 = vpow2.f32 %v581_v0 }
 0x154   :  { %668 = vtanh.f32 %v421_v56 }
 0x15b   :  { %v665_v1 = vpop.eup %664 }
 0x15c   :  { %v437_v2 = vadd.f32 1.0, %v665_v1 }
 0x15d   :  { %v667_v3 = vpop.eup %666 }
 0x15e   :  { %670 = vrcp.f32 %v437_v2  ;;  %v438_v4 = vadd.f32 1.0, %v667_v3  ;;  %v669_v5 = vpop.eup %668 }
 0x15f   :  { %672 = vtanh.f32 %v425_v60 }
 0x160   :  { %674 = vrcp.f32 %v438_v4 }
 0x168   :  { %v671_v6 = vpop.eup %670 }
 0x169   :  { %v673_v8 = vpop.eup %672  ;;  %v443_v9 = vmul.f32 %v671_v6, %v669_v5 }
 0x16a   :  { %v675_v10 = vpop.eup %674 }
 0x16b   :  { %v452_v11 = vmul.f32 %v582_v7, %v443_v9  ;;  %v444_v12 = vmul.f32 %v675_v10, %v673_v8 }
 0x16d   :  { %454 = vadd.xlane.f32.xlu0 %v452_v11  ;;  %v453_v13 = vmul.f32 %v582_v7, %v444_v12 }
 0x171   :  { %456 = vadd.xlane.f32.xlu0 %v453_v13 }
 0x1fa   :  { %v455_v14 = vpop.xlane.xlu0 %454 }
 0x1fb   :  { %v458_v15 = vrot.slane %v455_v14, 4 }
 0x1fd   :  { %v459_v16 = vmax.f32 %v455_v14, %v458_v15 }
 0x1fe   :  { %v457_v17 = vpop.xlane.xlu0 %456 }
 0x1ff   :  { %v460_v18 = vrot.slane %v459_v16, 2  ;;  %v464_v19 = vrot.slane %v457_v17, 4 }
 0x201   :  { %v461_v20 = vmax.f32 %v459_v16, %v460_v18  ;;  %v465_v21 = vmax.f32 %v457_v17, %v464_v19 }
 0x203   :  { %v462_v22 = vrot.slane %v461_v20, 1  ;;  %v466_v23 = vrot.slane %v465_v21, 2 }
 0x205   :  { %v463_v24 = vmax.f32 %v461_v20, %v462_v22  ;;  %v467_v25 = vmax.f32 %v465_v21, %v466_v23 }
 0x207   :  { %v470_v26 = vsub.f32 %v455_v14, %v463_v24  ;;  %v468_v27 = vrot.slane %v467_v25, 1 }
 0x209   :  { %v472_v28 = vmul.f32 1.442695, %v470_v26  ;;  %v469_v29 = vmax.f32 %v467_v25, %v468_v27 }
 0x20b   :  { %676 = vpow2.f32 %v472_v28  ;;  %v471_v30 = vsub.f32 %v457_v17, %v469_v29 }
 0x20d   :  { %v474_v31 = vmul.f32 1.442695, %v471_v30 }
 0x20f   :  { %678 = vpow2.f32 %v474_v31 }
 0x215   :  { %v677_v33 = vpop.eup %676 }
 0x216   :  { %v476_v34 = vrot.slane %v677_v33, 4  ;;  %v490_v35 = vmul.f32 %v677_v33, %v488_v32 }
 0x218   :  { %v477_v37 = vadd.f32 %v677_v33, %v476_v34  ;;  %v493_v38 = vsel %vm492_vm3, %v490_v35, 0.0 }
 0x219   :  { %v679_v39 = vpop.eup %678  ;;  %v494_v43 = vrot.slane %v493_v38, 4 }
 0x21a   :  { %v478_v40 = vrot.slane %v477_v37, 2  ;;  %v482_v41 = vrot.slane %v679_v39, 4  ;;  %v491_v42 = vmul.f32 %v679_v39, %v489_v36 }
 0x21b   :  { %v495_v50 = vadd.f32 %v494_v43, %v493_v38 }
 0x21c   :  { %v479_v44 = vadd.f32 %v478_v40, %v477_v37  ;;  %v483_v45 = vadd.f32 %v679_v39, %v482_v41  ;;  %v500_v46 = vsel %vm492_vm3, %v491_v42, 0.0 }
 0x21d   :  { %v501_v47 = vrot.slane %v500_v46, 4  ;;  %v496_v55 = vrot.slane %v495_v50, 2 }
 0x21e   :  { %v480_v48 = vrot.slane %v479_v44, 1  ;;  %v484_v49 = vrot.slane %v483_v45, 2 }
 0x21f   :  { %v502_v51 = vadd.f32 %v501_v47, %v500_v46  ;;  %v497_v58 = vadd.f32 %v496_v55, %v495_v50 }
 0x220   :  { %v481_v52 = vadd.f32 %v480_v48, %v479_v44  ;;  %v485_v53 = vadd.f32 %v484_v49, %v483_v45 }
 0x221   :  { %v503_v56 = vrot.slane %v502_v51, 2  ;;  %v498_v60 = vrot.slane %v497_v58, 1 }
 0x222   :  { %v486_v54 = vrot.slane %v485_v53, 1  ;;  %680 = vrcp.f32 %v481_v52 }
 0x223   :  { %v504_v59 = vadd.f32 %v503_v56, %v502_v51  ;;  %v499_v63 = vadd.f32 %v498_v60, %v497_v58 }
 0x224   :  { %v487_v57 = vadd.f32 %v486_v54, %v485_v53 }
 0x225   :  { %v505_v61 = vrot.slane %v504_v59, 1 }
 0x226   :  { %682 = vrcp.f32 %v487_v57 }
 0x227   :  { %v506_v0 = vadd.f32 %v505_v61, %v504_v59 }
 0x22c   :  { %v681_v62 = vpop.eup %680 }
 0x22d   :  { %v509_v2 = vmul.f32 %v681_v62, %v499_v63 }
 0x230   :  { %v683_v1 = vpop.eup %682 }
 0x231   :  { %v510_v3 = vmul.f32 %v683_v1, %v506_v0 }
 0x233   :  { %v514_v4 = vsel %vm513_vm4, %v510_v3, %v509_v2 }
 0x234   :  { %517 = vst.msk [vmem:[#allocation8] sm:$0x3] %vm516_vm5, %v514_v4 }
 0x235   :  { %761 = shalt.err (!%p758_p0)
}
 0x236   :  { %s762_s6 = scalar_lea.hbm %s874_s4, 32 }
 0x237   :  { %p763_p1 = scmp.ne.s32.totalorder %s874_s4, %s762_s6  ;;  %p766_p2 = scmp.lt.u32.totalorder %s762_s6, %s874_s4 }
 0x239   :  { %p768_p3 = pnand %p766_p2, %p763_p1 }
 0x23b   :  { %771 = shalt.err (!%p768_p3)
}
 0x23c   :  { %527 = dma.vmem_to_hbm [thread:$0]  %s525_s26, 32, %s874_s4, [#allocation4]  }
 0x23d   :  { %776 = dma.done.wait [#allocation4], 32  }
 0x23e   :  { %777 = vsyncadd [#allocation4], 4294967264 }
 0x23f   :  { %531 = vsyncpa [#allocation3], 1 }
 0x240   :  { %532 = vsyncpa [#allocation6], 1 }
 0x241   :  { %533 = vsyncpa [#allocation4], 1 }

</bundles_post_ra>
